<compile_context>
chip_gen: v7x
topology: tpu7x:2x2x1
jax: 0.10.0
libtpu: 0.0.40
codegen_flags: <defaults>
</compile_context>

<pallas_src>
import functools

import jax
import jax.numpy as jnp
from jax.experimental import pallas as pl
from jax.experimental.pallas import tpu as pltpu

IGNORE_INDEX = -100  # nn.NLLLoss default


def _ce2d_kernel(x_ref, t_ref, out_ref, *, ignore_index, hw, thw):
    """Per-tile partial (loss-sum, valid-count).

    x_ref:   (1, C, thw) logits tile  (classes on sublanes, pixels on lanes)
    t_ref:   (1, 1, thw) int32 target-id tile
    out_ref: (1, 1, 2, 128) f32 -> row 0 = loss sum, row 1 = valid count (lane splat)
    """
    j = pl.program_id(1)

    x = x_ref[0].astype(jnp.float32)   # (C, thw)
    t = t_ref[0]                       # (1, thw)
    C = x.shape[0]

    # Mask pixels past the true H*W extent (the last tile may run off the end; its
    # out-of-bounds lanes hold undefined VMEM data, so keep select-based masking).
    lane = jax.lax.broadcasted_iota(jnp.int32, (1, thw), 1)
    in_bounds = (j * thw + lane) < hw                        # (1, thw)
    valid = jnp.logical_and(t != ignore_index, in_bounds)    # (1, thw)
    t_safe = jnp.where(valid, t, 0)

    # Numerically stable log-sum-exp over the class (sublane) axis, reusing x - m
    # for both the exp() path and the target-logit gather.
    m = jnp.max(x, axis=0, keepdims=True)                    # (1, thw)
    xm = x - m                                               # (C, thw)
    sumexp = jnp.sum(jnp.exp(xm), axis=0, keepdims=True)     # (1, thw)

    rows = jax.lax.broadcasted_iota(jnp.int32, (C, thw), 0)
    picked_xm = jnp.sum(jnp.where(rows == t_safe, xm, 0.0),  # x[t] - m, (1, thw)
                        axis=0, keepdims=True)

    # -log p[target] = lse - x[t] = log(sumexp) - (x[t] - m); 0 for ignored/oob px.
    per_px = jnp.where(valid, jnp.log(sumexp) - picked_xm, 0.0)
    cnt = jnp.where(valid, 1.0, 0.0)

    loss_sum = jnp.sum(per_px)
    cnt_sum = jnp.sum(cnt)

    # Single fused lane-dense output block per step (one output DMA descriptor).
    row = jax.lax.broadcasted_iota(jnp.int32, (2, 128), 0)
    out_ref[...] = jnp.where(row == 0, loss_sum, cnt_sum).reshape(1, 1, 2, 128)


def _vmem_capacity_bytes():
    try:
        return int(pltpu.get_tpu_info().vmem_capacity_bytes)
    except Exception:
        return 64 * 1024 * 1024  # conservative (v7x-sized) fallback


def cross_entropy_loss_2d(inputs, targets, *, ignore_index=IGNORE_INDEX):
    """inputs: (N, C, H, W) float; targets: (N, H, W) int class ids.

    Returns the scalar mean NLL over non-ignored pixels (weight=None,
    size_average=True).  All-ignored input yields 0/0 = NaN, matching PyTorch's
    'mean' reduction.  Out-of-range labels (t >= C, or negative != ignore_index)
    are not range-checked (they contribute lse instead of raising).
    """
    N, C, H, W = inputs.shape
    HW = H * W

    # Free reshapes only: keep the native NCHW memory order, no transpose, no pad.
    x = inputs.reshape(N, C, HW)
    t = targets.reshape(N, 1, HW).astype(jnp.int32)
    # TODO(synk): accept int16/uint8 targets end-to-end to cut target HBM traffic
    # (an in-wrapper downcast would add its own HBM pass and net ~zero).

    itemsize = jnp.dtype(x.dtype).itemsize

    # Generation-aware tile sizing: v5e/v6e have 128 MiB physical VMEM, v7x 64 MiB.
    vmem_cap = _vmem_capacity_bytes()
    if vmem_cap >= 96 * 1024 * 1024:      # v5e / v6e
        tile_budget = 12 * 1024 * 1024    # logits bytes per grid step
        vmem_limit = 48 * 1024 * 1024
    else:                                 # v7x (or unknown): stay conservative
        tile_budget = 8 * 1024 * 1024
        vmem_limit = 32 * 1024 * 1024

    # Pixels per tile: multiple of 128 lanes, capped by the lane-aligned extent.
    target_px = max(128, (tile_budget // (C * itemsize)) // 128 * 128)
    if HW >= 128:
        thw = min(target_px, (HW // 128) * 128)
    else:
        thw = HW  # full-extent block for tiny spatial dims
    T = pl.cdiv(HW, thw)

    # v7x shards parallel grid axes across 2 TensorCores: avoid a 1-step grid.
    if N == 1 and T == 1 and HW >= 256:
        thw = max(128, ((HW // 2) // 128) * 128)
        T = pl.cdiv(HW, thw)

    kernel = functools.partial(_ce2d_kernel, ignore_index=ignore_index, hw=HW, thw=thw)

    parts = pl.pallas_call(
        kernel,
        out_shape=jax.ShapeDtypeStruct((N, T, 2, 128), jnp.float32),
        grid_spec=pltpu.PrefetchScalarGridSpec(
            num_scalar_prefetch=0,
            grid=(N, T),
            in_specs=[
                pl.BlockSpec((1, C, thw), lambda n, j: (n, 0, j)),   # logits tile
                pl.BlockSpec((1, 1, thw), lambda n, j: (n, 0, j)),   # target ids tile
            ],
            out_specs=pl.BlockSpec((1, 1, 2, 128), lambda n, j: (n, j, 0, 0)),
        ),
        compiler_params=pltpu.CompilerParams(
            dimension_semantics=("parallel", "parallel"),
            vmem_limit_bytes=vmem_limit,
        ),
    )(x, t)

    total = jnp.sum(parts[:, :, 0, 0])
    # Per-tile counts are exact in f32; do the tiny N*T cross-tile sum in int32 so
    # the mean does not drift past 2^24 valid pixels.
    count = jnp.sum(parts[:, :, 1, 0].astype(jnp.int32))
    # size_average=True, weight=None -> mean over non-ignored elements.
    return total / count.astype(jnp.float32)


def _reference(inputs, targets, ignore_index=IGNORE_INDEX):
    N, C, H, W = inputs.shape
    logp = jax.nn.log_softmax(inputs.astype(jnp.float32), axis=1)
    lp = jnp.transpose(logp, (0, 2, 3, 1)).reshape(-1, C)
    t = targets.reshape(-1)
    valid = t != ignore_index
    t_safe = jnp.where(valid, t, 0)
    picked = jnp.take_along_axis(lp, t_safe[:, None], axis=1)[:, 0]
    loss = jnp.where(valid, -picked, 0.0)
    return jnp.sum(loss) / jnp.sum(valid.astype(jnp.float32))


if __name__ == "__main__":
    key = jax.random.PRNGKey(0)
    k_x, k_t = jax.random.split(key)

    N, C, H, W = 2, 4, 16, 16
    inputs = jax.random.normal(k_x, (N, C, H, W), dtype=jnp.float32)
    targets = jax.random.randint(k_t, (N, H, W), 0, C, dtype=jnp.int32)
    # sprinkle a few ignore_index entries to exercise the masking path
    targets = targets.at[0, 0, 0].set(IGNORE_INDEX)
    targets = targets.at[1, 3, 7].set(IGNORE_INDEX)

    loss = jax.block_until_ready(cross_entropy_loss_2d(inputs, targets))
    ref = jax.block_until_ready(_reference(inputs, targets))
    assert jnp.allclose(loss, ref, rtol=1e-5, atol=1e-5), (loss, ref)
    print("KERNEL_OK")
</pallas_src>

<mosaic_0001>
module attributes {stable_mosaic.version = 11 : i64} {
  func.func @_ce2d_kernel(%arg0: i32, %arg1: i32, %arg2: memref<1x4x256xf32, #tpu.memory_space<vmem>>, %arg3: memref<1x1x256xi32, #tpu.memory_space<vmem>>, %arg4: memref<1x1x2x128xf32, #tpu.memory_space<vmem>>) attributes {dimension_semantics = [#tpu.dimension_semantics<parallel>, #tpu.dimension_semantics<parallel>], iteration_bounds = array<i64: 2, 1>, scalar_prefetch = 0 : i64, scratch_operands = 0 : i64, tpu.core_type = #tpu.core_type<tc>, window_params = [{transform_indices = @transform_0, window_bounds = array<i64: 1, 4, 256>}, {transform_indices = @transform_1, window_bounds = array<i64: 1, 1, 256>}, {transform_indices = @transform_2, window_bounds = array<i64: 1, 1, 2, 128>}]} {
    %c0 = arith.constant 0 : index
    %c0_0 = arith.constant 0 : index
    %c0_1 = arith.constant 0 : index
    %0 = vector.load %arg2[%c0, %c0_0, %c0_1] : memref<1x4x256xf32, #tpu.memory_space<vmem>>, vector<1x4x256xf32>
    %1 = vector.shape_cast %0 : vector<1x4x256xf32> to vector<4x256xf32>
    %c0_2 = arith.constant 0 : index
    %c0_3 = arith.constant 0 : index
    %c0_4 = arith.constant 0 : index
    %2 = vector.load %arg3[%c0_2, %c0_3, %c0_4] : memref<1x1x256xi32, #tpu.memory_space<vmem>>, vector<1x1x256xi32>
    %3 = vector.shape_cast %2 : vector<1x1x256xi32> to vector<1x256xi32>
    %4 = tpu.iota {dimensions = array<i32: 1>} : vector<1x256xi32>
    %c256_i32 = arith.constant 256 : i32
    %5 = arith.muli %arg1, %c256_i32 : i32
    %6 = vector.broadcast %5 : i32 to vector<1x256xi32>
    %7 = arith.addi %6, %4 : vector<1x256xi32>
    %c256_i32_5 = arith.constant 256 : i32
    %8 = vector.broadcast %c256_i32_5 : i32 to vector<1x256xi32>
    %9 = arith.cmpi slt, %7, %8 : vector<1x256xi32>
    %c-100_i32 = arith.constant -100 : i32
    %10 = vector.broadcast %c-100_i32 : i32 to vector<1x256xi32>
    %11 = arith.cmpi ne, %3, %10 : vector<1x256xi32>
    %12 = arith.andi %11, %9 : vector<1x256xi1>
    %c0_i32 = arith.constant 0 : i32
    %13 = vector.broadcast %c0_i32 : i32 to vector<1x256xi32>
    %14 = arith.select %12, %3, %13 : vector<1x256xi1>, vector<1x256xi32>
    %cst = arith.constant dense<0xFF800000> : vector<256xf32>
    %15 = vector.multi_reduction <maximumf>, %1, %cst [0] : vector<4x256xf32> to vector<256xf32>
    %16 = vector.shape_cast %15 : vector<256xf32> to vector<1x256xf32>
    %17 = vector.broadcast %16 : vector<1x256xf32> to vector<4x256xf32>
    %18 = arith.subf %1, %17 : vector<4x256xf32>
    %19 = math.exp %18 : vector<4x256xf32>
    %cst_6 = arith.constant dense<0.000000e+00> : vector<256xf32>
    %20 = vector.multi_reduction <add>, %19, %cst_6 [0] : vector<4x256xf32> to vector<256xf32>
    %21 = vector.shape_cast %20 : vector<256xf32> to vector<1x256xf32>
    %22 = tpu.iota {dimensions = array<i32: 0>} : vector<4x256xi32>
    %23 = vector.broadcast %14 : vector<1x256xi32> to vector<4x256xi32>
    %24 = arith.cmpi eq, %22, %23 : vector<4x256xi32>
    %cst_7 = arith.constant 0.000000e+00 : f32
    %25 = vector.broadcast %cst_7 : f32 to vector<4x256xf32>
    %26 = arith.select %24, %18, %25 : vector<4x256xi1>, vector<4x256xf32>
    %cst_8 = arith.constant dense<0.000000e+00> : vector<256xf32>
    %27 = vector.multi_reduction <add>, %26, %cst_8 [0] : vector<4x256xf32> to vector<256xf32>
    %28 = vector.shape_cast %27 : vector<256xf32> to vector<1x256xf32>
    %29 = math.log %21 : vector<1x256xf32>
    %30 = arith.subf %29, %28 : vector<1x256xf32>
    %cst_9 = arith.constant 0.000000e+00 : f32
    %31 = vector.broadcast %cst_9 : f32 to vector<1x256xf32>
    %32 = arith.select %12, %30, %31 : vector<1x256xi1>, vector<1x256xf32>
    %cst_10 = arith.constant 1.000000e+00 : f32
    %cst_11 = arith.constant 0.000000e+00 : f32
    %33 = vector.broadcast %cst_10 : f32 to vector<1x256xf32>
    %34 = vector.broadcast %cst_11 : f32 to vector<1x256xf32>
    %35 = arith.select %12, %33, %34 : vector<1x256xi1>, vector<1x256xf32>
    %36 = vector.shape_cast %32 : vector<1x256xf32> to vector<1x1x256xf32>
    %cst_12 = arith.constant dense<0.000000e+00> : vector<1xf32>
    %37 = vector.multi_reduction <add>, %36, %cst_12 [1, 2] : vector<1x1x256xf32> to vector<1xf32>
    %38 = vector.shape_cast %37 : vector<1xf32> to vector<1x1x1xf32>
    %39 = vector.extract %38[0, 0, 0] : f32 from vector<1x1x1xf32>
    %40 = vector.shape_cast %35 : vector<1x256xf32> to vector<1x1x256xf32>
    %cst_13 = arith.constant dense<0.000000e+00> : vector<1xf32>
    %41 = vector.multi_reduction <add>, %40, %cst_13 [1, 2] : vector<1x1x256xf32> to vector<1xf32>
    %42 = vector.shape_cast %41 : vector<1xf32> to vector<1x1x1xf32>
    %43 = vector.extract %42[0, 0, 0] : f32 from vector<1x1x1xf32>
    %44 = tpu.iota {dimensions = array<i32: 0>} : vector<2x128xi32>
    %c0_i32_14 = arith.constant 0 : i32
    %45 = vector.broadcast %c0_i32_14 : i32 to vector<2x128xi32>
    %46 = arith.cmpi eq, %44, %45 : vector<2x128xi32>
    %47 = vector.broadcast %39 : f32 to vector<2x128xf32>
    %48 = vector.broadcast %43 : f32 to vector<2x128xf32>
    %49 = arith.select %46, %47, %48 : vector<2x128xi1>, vector<2x128xf32>
    %50 = vector.shape_cast %49 : vector<2x128xf32> to vector<1x1x2x128xf32>
    %c0_15 = arith.constant 0 : index
    %c0_16 = arith.constant 0 : index
    %c0_17 = arith.constant 0 : index
    %c0_18 = arith.constant 0 : index
    %51 = vector.load %arg4[%c0_15, %c0_16, %c0_17, %c0_18] : memref<1x1x2x128xf32, #tpu.memory_space<vmem>>, vector<1x1x2x128xf32>
    tpu.vector_store %arg4[%c0_15, %c0_16, %c0_17, %c0_18], %50 {strides = array<i32>} : memref<1x1x2x128xf32, #tpu.memory_space<vmem>>, vector<1x1x2x128xf32>,
    return
  }
  func.func @transform_0(%arg0: i32, %arg1: i32) -> (i32, i32, i32) {
    %c0_i32 = arith.constant 0 : i32
    %c0_i32_0 = arith.constant 0 : i32
    return %arg0, %c0_i32, %arg1 : i32, i32, i32
  }
  func.func @transform_1(%arg0: i32, %arg1: i32) -> (i32, i32, i32) {
    %c0_i32 = arith.constant 0 : i32
    %c0_i32_0 = arith.constant 0 : i32
    return %arg0, %c0_i32, %arg1 : i32, i32, i32
  }
  func.func @transform_2(%arg0: i32, %arg1: i32) -> (i32, i32, i32, i32) {
    %c0_i32 = arith.constant 0 : i32
    %c0_i32_0 = arith.constant 0 : i32
    %c0_i32_1 = arith.constant 0 : i32
    return %arg0, %arg1, %c0_i32, %c0_i32_0 : i32, i32, i32, i32
  }
}

</mosaic_0001>

<bundles_post_ra>
// kernel: tpu_custom_call.1
= control target key start
LH: loop header
LB: loop body
LE: loop exit
PB: predicated region body
PF: predicated region fallthrough
CT: control target
= control target key end

     0   :  { %7 = vsyncpa [#allocation3], 0  ;;  %s1052_s0 = inlined_call_operand.hbm [shape: f32[2,4,256], index: 0, kind: input, shape index: {}]   ;;  %s1053_s1 = inlined_call_operand.hbm [shape: s32[2,1,256], index: 1, kind: input, shape index: {}]   ;;  %s1054_s2 = inlined_call_operand.hbm [shape: f32[2,1,2,128], index: 2, kind: output, shape index: {}]  }
   0x1   :  { %9 = vsyncpa [#allocation3 + $0x1], 0 }
   0x2   :  { %10 = vsyncpa [#allocation6], 0 }
   0x3   :  { %12 = vsyncpa [#allocation6 + $0x1], 0 }
   0x4   :  { %13 = vsyncpa [#allocation4], 0 }
   0x5   :  { %15 = vsyncpa [#allocation4 + $0x1], 0  ;;  %s798_s9 = smov 0   ;;  %s800_s10 = smov 0  }
   0x6   :  { %s802_s11 = smov 0   ;;  %s804_s12 = smov 0  }
   0x7   :  { %s806_s13 = smov 0   ;;  %s808_s14 = smov 0  }
   0x8 LB: > { %s528_s15 = sadd.s32 4294967295, %s775_s14   ;;  %s529_s16 = sadd.s32 4294967294, %s775_s14   ;;  %s775_s14 = sphi %s808_s14, %s21_s14   ;;  %s771_s13 = sphi %s806_s13, %s1076_s13   ;;  %s767_s12 = sphi %s804_s12, %s1075_s12   ;;  %s763_s11 = sphi %s802_s11, %s1074_s11   ;;  %s759_s10 = sphi %s800_s10, %s1073_s10   ;;  %s755_s9 = sphi %s798_s9, %s1072_s9  }
   0x9   : > { %s33_s17 = sadd.s32 1, %s771_s13  ;;  %s42_s18 = sadd.s32 1, %s763_s11 }
   0xa   : > { %p35_p0 = scmp.ge.s32.totalorder %s33_s17, 2  ;;  %p49_p1 = scmp.ne.s32.totalorder %s763_s11, %s759_s10 }
   0xb   : > { %p50_p2 = scmp.eq.s32.totalorder %s775_s14, 0  ;;  %p55_p3 = scmp.ne.s32.totalorder %s759_s10, %s755_s9 }
   0xc   : > { %s1078_s17 = smov (%p35_p0, %s33_s17), 0  ;;  %p56_p5 = scmp.eq.s32.totalorder %s528_s15, 0 }
   0xd   : > { %p839_p4 = por %p50_p2, %p49_p1  ;;  %s37_s20 = ssub.s32 %s771_s13, %s1078_s17 }
   0xe   : > { %p109_p6 = scmp.eq.s32.totalorder %s528_s15, 1  ;;  %p40_p7 = scmp.eq.s32.totalorder %s37_s20, 0 }
   0xf   : > { %p845_p8 = por %p56_p5, %p55_p3  ;;  %p115_p10 = scmp.eq.s32.totalorder %s529_s16, 1 }
  0x10   : > { %p849_p9 = por %p109_p6, %p49_p1  ;;  %p569_p13 = scmp.lt.s32.totalorder %s775_s14, 2 }
  0x11   : > { %s1058_s21 = scalar_select %p845_p8, 1, 0 }
  0x12   : > { %s1059_s22 = scalar_select %p849_p9, 1, 0 }
  0x13   : > { %s854_s23 = scalar_select %p40_p7, %s763_s11, %s42_s18  }
  0x14   : > { %p856_p11 = por %p115_p10, %p55_p3  ;;  %s863_s25 = sand.u32 1, %s763_s11  }
  0x15   : > { %s532_s26 = sshll.u32 %s863_s25, 3  ;;  %s546_s27 = sshll.u32 %s771_s13, 7 }
  0x16   : > { %s1060_s24 = scalar_select %p856_p11, 1, 0 }
  0x17   : > { %s870_s30 = scalar_lea.hbm %s1052_s0, %s546_s27  ;;  %s139_s3 = scalar_lea.vmem [#allocation2], %s532_s26 }
  0x18   : > { %s149_s4 = sshll.u32 %s139_s3, 4  ;;  %p876_p0 = pnand %p569_p13, %p839_p4  ;;  %s872_s4 = int_to_ptr.vmem [resolvable:$true] %s149_s4 }
  0x19   : > { %s136_s6 = scalar_lea.sflag [#allocation3], %s863_s25  ;;  %s629_s7 = scalar_lea.hbm %s870_s30, 128 }
  0x1a   : > { %p630_p3 = scmp.ne.s32.totalorder %s870_s30, %s629_s7  ;;  %p631_p5 = pneg %p876_p0 }
  0x1b   : > { %s634_s16 = scalar_lea.hbm %s1052_s0, 256  ;;  %p635_p4 = scmp.lt.u32.totalorder %s870_s30, %s1052_s0 }
  0x1c   : > { %p632_p6 = pnand %p631_p5, %p630_p3  ;;  %p636_p10 = scmp.lt.u32.totalorder %s634_s16, %s629_s7 }
  0x1d   : > { %p638_p12 = scmp.lt.u32.totalorder %s629_s7, %s870_s30 }
  0x1e   : > { %p633_p7 = pneg %p632_p6  ;;  %p637_p13 = por %p636_p10, %p635_p4 }
  0x20   : > { %p639_p1 = por %p638_p12, %p637_p13 }
  0x22   : > { %p640_p2 = pnand %p639_p1, %p633_p7 }
  0x24   : > { %643 = shalt.err (!%p640_p2)
}
  0x25   : > { %s644_s20 = scalar_lea.vmem %s872_s4, 128  ;;  %s777_s26 = smov [#allocation2]  }
  0x26   : > { %p645_p3 = scmp.ne.s32.totalorder %s872_s4, %s644_s20  ;;  %s649_s27 = sshll.u32 %s777_s26, 4  ;;  %s650_s27 = int_to_ptr.vmem [resolvable:$false] %s649_s27 }
  0x27   : > { %s651_s28 = scalar_lea.vmem %s650_s27, 256  ;;  %p652_p9 = scmp.lt.s32.totalorder %s872_s4, %s650_s27 }
  0x28   : > { %p647_p6 = pnand %p645_p3, %p631_p5  ;;  %p653_p4 = scmp.lt.s32.totalorder %s651_s28, %s644_s20 }
  0x2a   : > { %p648_p11 = pneg %p647_p6  ;;  %p654_p10 = por %p653_p4, %p652_p9 }
  0x2c   : > { %p655_p12 = pnand %p654_p10, %p648_p11 }
  0x2e   : > { %658 = shalt.err (!%p655_p12)
}
  0x2f   : > { %561 = dma.hbm_to_vmem [thread:$0]  (!%p876_p0), %s870_s30, 128, %s872_s4, %s136_s6  }
  0x30   : > { %p1062_p1 = scmp.lt.s32.totalorder %s775_s14, 3  ;;  %p1063_p2 = scmp.ge.s32.totalorder %s775_s14, 1 }
  0x31   : > { %s535_s3 = sshll.u32 %s863_s25, 1  ;;  %s547_s7 = sshll.u32 %s771_s13, 5 }
  0x32   : > { %p912_p7 = pnand %p1063_p2, %p1062_p1  ;;  %s921_s16 = scalar_lea.hbm %s1053_s1, %s547_s7 }
  0x33   : > { %s160_s18 = scalar_lea.vmem [#allocation5], %s535_s3  ;;  %s157_s30 = scalar_lea.sflag [#allocation6], %s863_s25 }
  0x34   : > { %s1064_s29 = scalar_select %p912_p7, 1, 0 }
  0x35   : > { %s170_s19 = sshll.u32 %s160_s18, 4  ;;  %s659_s4 = scalar_lea.hbm %s921_s16, 32  ;;  %s171_s19 = int_to_ptr.vmem [resolvable:$true] %s170_s19 }
  0x36   : > { %p660_p9 = scmp.ne.s32.totalorder %s921_s16, %s659_s4  ;;  %s664_s26 = scalar_lea.hbm %s1053_s1, 64 }
  0x37   : > { %p665_p3 = scmp.lt.u32.totalorder %s921_s16, %s1053_s1  ;;  %p666_p6 = scmp.lt.u32.totalorder %s664_s26, %s659_s4 }
  0x38   : > { %p662_p11 = pnand %p660_p9, %p631_p5  ;;  %p668_p10 = scmp.lt.u32.totalorder %s659_s4, %s921_s16 }
  0x39   : > { %p667_p4 = por %p666_p6, %p665_p3 }
  0x3a   : > { %p663_p13 = pneg %p662_p11 }
  0x3b   : > { %p669_p12 = por %p668_p10, %p667_p4 }
  0x3d   : > { %p670_p1 = pnand %p669_p12, %p663_p13 }
  0x3f   : > { %673 = shalt.err (!%p670_p1)
}
  0x40   : > { %s674_s25 = scalar_lea.vmem %s171_s19, 32  ;;  %s778_s3 = smov [#allocation5]  }
  0x41   : > { %p675_p2 = scmp.ne.s32.totalorder %s171_s19, %s674_s25  ;;  %s679_s7 = sshll.u32 %s778_s3, 4  ;;  %s680_s7 = int_to_ptr.vmem [resolvable:$false] %s679_s7 }
  0x42   : > { %s681_s8 = scalar_lea.vmem %s680_s7, 64  ;;  %p682_p8 = scmp.lt.s32.totalorder %s171_s19, %s680_s7 }
  0x43   : > { %p677_p9 = pnand %p675_p2, %p631_p5  ;;  %p683_p7 = scmp.lt.s32.totalorder %s681_s8, %s674_s25 }
  0x45   : > { %p678_p11 = pneg %p677_p9  ;;  %p684_p3 = por %p683_p7, %p682_p8 }
  0x47   : > { %p685_p6 = pnand %p684_p3, %p678_p11 }
  0x49   : > { %688 = shalt.err (!%p685_p6)
}
  0x4a   : > { %564 = dma.hbm_to_vmem [thread:$0]  (!%p876_p0), %s921_s16, 32, %s171_s19, %s157_s30  }
  0x4b   : > { %p1065_p13 = scmp.ne.s32.totalorder %s1064_s29, 0 }
  0x4c   : > { %s946_s15 = sand.u32 (!%p1065_p13), 1, %s759_s10   ;;  %p1066_p5 = scmp.ne.s32.totalorder (!%p1065_p13), %s1058_s21, 0 }
  0x4d   : > { %179 = sbr.rel (%p1065_p13) target bundleno = 387 (0x183), region = 28  ;;  %s539_s18 = sshll.u32 (!%p1065_p13), %s946_s15, 3 }
  0x4e   : > { %s182_s4 = scalar_lea.sflag (!%p1065_p13), [#allocation3], %s946_s15  ;;  %s185_s6 = scalar_lea.vmem (!%p1065_p13), [#allocation2], %s539_s18 }
  0x54   : > { %742 = dma.done.wait (%p1066_p5), %s182_s4, 128  }
  0x55   : > { %744 = vsyncadd (%p1066_p5), %s182_s4, 4294967168  ;;  %s540_s5 = sshll.u32 %s946_s15, 1  ;;  %s191_s29 = scalar_lea.sflag [#allocation6], %s946_s15 }
  0x56   : > { %s194_s16 = scalar_lea.vmem [#allocation5], %s540_s5 }
  0x57   : > { %746 = dma.done.wait (%p1066_p5), %s191_s29, 32  }
  0x58   : > { %748 = vsyncadd (%p1066_p5), %s191_s29, 4294967264  ;;  %v240_v0 = vlaneseq  ;;  %v779_v1 = vmov 1966171168   ;;  %vm257_vm0 = vcmask 1043456   ;;  %v222_v5 = vld [vmem:[%s185_s6] sm:$0xff]  ;;  %v780_v6 = vmov 1  }
  0x59   : > { %v238_v2 = vunpack.c.l.s4 %v779_v1  ;;  %v236_v7 = vcombine.low %v780_v6, %v780_v6  ;;  %v255_v9 = vcombine.high %v222_v5, %v222_v5  ;;  %v258_v10 = vsel %vm257_vm0, %v222_v5, -inf  ;;  %v223_v21 = vld [vmem:[%s194_s16] sm:$0x3]  ;;  %s543_s21 = sshll.u32 %s767_s12, 5  ;;  %s219_s30 = scalar_lea.vmem [#allocation7], %s540_s5 }
  0x5a   : > { %v962_v4 = vshrl.u32 %v240_v0, 7  ;;  %v259_v11 = vrot.slane %v258_v10, 4  ;;  %vm233_vm1 = vcmp.ne.s32.totalorder %v223_v21, 4294967196  ;;  %vm364_vm6 = vcmask 1040384   ;;  %s420_s20 = sshll.u32 %s219_s30, 4  ;;  %s1003_s25 = scalar_lea.hbm %s1054_s2, %s543_s21  ;;  %s1005_s20 = int_to_ptr.vmem [resolvable:$true] %s420_s20 }
  0x5b   : > { %v239_v3 = vunpack.c.0.s8 %v238_v2  ;;  %v265_v12 = vsel %vm257_vm0, %v255_v9, -inf  ;;  %s406_s12 = scalar_lea.sflag [#allocation4], %s946_s15  ;;  %s689_s3 = scalar_lea.vmem %s1005_s20, 32 }
  0x5c   : > { %v260_v13 = vmax.f32 %v258_v10, %v259_v11  ;;  %v266_v14 = vrot.slane %v265_v12, 4  ;;  %v976_v30 = vsub.s32 0, %v962_v4  ;;  %v304_v33 = vsub.s32 1, %v962_v4  ;;  %p690_p8 = scmp.ne.s32.totalorder %s1005_s20, %s689_s3  ;;  %p1069_p0 = scmp.ne.s32.totalorder %s1059_s22, 0 }
  0x5d   : > { %v965_v8 = vsub.s32 %v239_v3, %v962_v4  ;;  %vm400_vm7 = vcmp.eq.s32.totalorder %v962_v4, 0  ;;  %s782_s7 = smov [#allocation7]  }
  0x5e   : > { %v261_v16 = vrot.slane %v260_v13, 2  ;;  %v267_v17 = vmax.f32 %v265_v12, %v266_v14  ;;  %p691_p7 = pnand %p690_p8, %p1069_p0  ;;  %s693_s8 = sshll.u32 %s782_s7, 4  ;;  %s694_s8 = int_to_ptr.vmem [resolvable:$false] %s693_s8 }
  0x5f   : > { %v243_v15 = vrot.slane %v236_v7, %v965_v8  ;;  %s695_s18 = scalar_lea.vmem %s694_s8, 64  ;;  %p696_p10 = scmp.lt.s32.totalorder %s1005_s20, %s694_s8 }
  0x60   : > { %v262_v18 = vmax.f32 %v260_v13, %v261_v16  ;;  %v268_v19 = vrot.slane %v267_v17, 2  ;;  %p692_p4 = pneg %p691_p7  ;;  %p697_p12 = scmp.lt.s32.totalorder %s695_s18, %s689_s3 }
  0x61   : > { %v250_v20 = vrot.slane %v243_v15, %v965_v8  ;;  %v781_v15 = vmov 0.0  }
  0x62   : > { %v263_v22 = vrot.slane %v262_v18, 1  ;;  %v269_v23 = vmax.f32 %v267_v17, %v268_v19  ;;  %p698_p1 = por %p697_p12, %p696_p10 }
  0x63   : > { %vm251_vm2 = vcmp.ne.s32.totalorder %v250_v20, 0 }
  0x64   : > { %v264_v24 = vmax.f32 %v262_v18, %v263_v22  ;;  %v270_v25 = vrot.slane %v269_v23, 1  ;;  %vm971_vm3 = vmand %vm233_vm1, %vm251_vm2  ;;  %p699_p2 = pnand %p698_p1, %p692_p4 }
  0x65   : > { %v253_v31 = vsel %vm971_vm3, %v223_v21, 0  ;;  %v352_v16 = vsel %vm971_vm3, 1.0, %v781_v15 }
  0x66   : > { %v271_v26 = vmax.f32 %v269_v23, %v270_v25  ;;  %v301_v34 = vrot.slane %v253_v31, %v976_v30  ;;  %v305_v35 = vrot.slane %v253_v31, %v304_v33  ;;  %v381_v18 = vrot.slane %v352_v16, %v976_v30 }
  0x67   : > { %v385_v19 = vrot.slane %v352_v16, %v304_v33 }
  0x68   : > { %v274_v28 = vcombine.low %v264_v24, %v271_v26  ;;  %vm306_vm4 = vcmp.eq.s32.totalorder %v962_v4, %v301_v34  ;;  %vm307_vm5 = vcmp.eq.s32.totalorder %v962_v4, %v305_v35  ;;  %v388_v25 = vsel %vm364_vm6, %v381_v18, 0.0 }
  0x69   : > { %v389_v26 = vsel %vm364_vm6, %v385_v19, 0.0 }
  0x6a   : > { %v276_v29 = vsub.f32 %v222_v5, %v274_v28 }
  0x6c   : > { %v277_v32 = vmul.f32 1.442695, %v276_v29  ;;  %v309_v36 = vcombine.high %v276_v29, %v276_v29  ;;  %v311_v37 = vsel %vm306_vm4, %v276_v29, 0.0  ;;  %v390_v29 = vadd.f32 %v389_v26, %v388_v25 }
  0x6d   : > { %v313_v40 = vsel %vm257_vm0, %v311_v37, 0.0 }
  0x6e   : > { %623 = vpow2.f32 %v277_v32  ;;  %v312_v38 = vsel %vm307_vm5, %v309_v36, 0.0  ;;  %v314_v46 = vrot.slane %v313_v40, 4 }
  0x6f   : > { %v320_v44 = vsel %vm257_vm0, %v312_v38, 0.0 }
  0x70   : > { %v321_v49 = vrot.slane %v320_v44, 4  ;;  %v315_v52 = vadd.f32 %v314_v46, %v313_v40 }
  0x72   : > { %v322_v55 = vadd.f32 %v321_v49, %v320_v44  ;;  %v316_v58 = vrot.slane %v315_v52, 2 }
  0x74   : > { %v323_v61 = vrot.slane %v322_v55, 2  ;;  %v317_v63 = vadd.f32 %v316_v58, %v315_v52 }
  0x76   : > { %v324_v0 = vadd.f32 %v323_v61, %v322_v55  ;;  %v318_v1 = vrot.slane %v317_v63, 1 }
  0x78   : > { %v624_v39 = vpop.eup %623  ;;  %v325_v2 = vrot.slane %v324_v0, 1  ;;  %v319_v3 = vadd.f32 %v318_v1, %v317_v63 }
  0x79   : > { %v280_v41 = vcombine.high %v624_v39, %v624_v39  ;;  %v282_v42 = vsel %vm257_vm0, %v624_v39, 0.0 }
  0x7a   : > { %v283_v43 = vrot.slane %v282_v42, 4  ;;  %v326_v6 = vadd.f32 %v325_v2, %v324_v0 }
  0x7b   : > { %v289_v45 = vsel %vm257_vm0, %v280_v41, 0.0 }
  0x7c   : > { %v284_v47 = vadd.f32 %v283_v43, %v282_v42  ;;  %v290_v48 = vrot.slane %v289_v45, 4 }
  0x7e   : > { %v285_v50 = vrot.slane %v284_v47, 2  ;;  %v291_v51 = vadd.f32 %v290_v48, %v289_v45 }
  0x80   : > { %v286_v53 = vadd.f32 %v285_v50, %v284_v47  ;;  %v292_v54 = vrot.slane %v291_v51, 2 }
  0x82   : > { %v287_v56 = vrot.slane %v286_v53, 1  ;;  %v293_v57 = vadd.f32 %v292_v54, %v291_v51 }
  0x84   : > { %v288_v59 = vadd.f32 %v287_v56, %v286_v53  ;;  %v294_v60 = vrot.slane %v293_v57, 1 }
  0x86   : > { %v295_v62 = vadd.f32 %v294_v60, %v293_v57  ;;  %625 = vlog2.f32 %v288_v59 }
  0x88   : > { %627 = vlog2.f32 %v295_v62 }
  0x90   : > { %v626_v5 = vpop.eup %625 }
  0x91   : > { %v328_v7 = vmul.f32 0.6931472, %v626_v5 }
  0x92   : > { %v628_v9 = vpop.eup %627 }
  0x93   : > { %v330_v10 = vmul.f32 0.6931472, %v628_v9  ;;  %v331_v11 = vsub.f32 %v328_v7, %v319_v3 }
  0x95   : > { %v332_v12 = vsub.f32 %v330_v10, %v326_v6 }
  0x97   : > { %v335_v13 = vcombine.low %v331_v11, %v332_v12 }
  0x99   : > { %v342_v14 = vrot.slane %v335_v13, %v965_v8 }
  0x9b   : > { %v349_v17 = vrot.slane %v342_v14, %v965_v8 }
  0x9d   : > { %v351_v20 = vsel %vm971_vm3, %v349_v17, 0.0 }
  0x9e   : > { %v357_v21 = vrot.slane %v351_v20, %v976_v30  ;;  %v361_v22 = vrot.slane %v351_v20, %v304_v33 }
  0xa0   : > { %v365_v23 = vsel %vm364_vm6, %v357_v21, 0.0  ;;  %v366_v24 = vsel %vm364_vm6, %v361_v22, 0.0 }
  0xa1   : > { %v367_v28 = vadd.f32 %v366_v24, %v365_v23 }
  0xa3   : > { %368 = vadd.xlane.f32.xlu0 %v367_v28 }
  0xa7   : > { %391 = vadd.xlane.f32.xlu0 %v390_v29 }
 0x130   : > { %v369_v31 = vpop.xlane.xlu0 %368 }
 0x131   : > { %v370_v8 = vrot.slane %v369_v31, 4 }
 0x133   : > { %v371_v32 = vadd.f32 %v370_v8, %v369_v31 }
 0x134   : > { %v392_v34 = vpop.xlane.xlu0 %391 }
 0x135   : > { %v372_v27 = vrot.slane %v371_v32, 2  ;;  %v393_v35 = vrot.slane %v392_v34, 4 }
 0x137   : > { %v394_v36 = vadd.f32 %v393_v35, %v392_v34  ;;  %v373_v37 = vadd.f32 %v372_v27, %v371_v32 }
 0x139   : > { %v395_v30 = vrot.slane %v394_v36, 2  ;;  %v374_v33 = vrot.slane %v373_v37, 1 }
 0x13b   : > { %v396_v38 = vadd.f32 %v395_v30, %v394_v36  ;;  %v375_v39 = vadd.f32 %v374_v33, %v373_v37 }
 0x13d   : > { %548 = vpush %v375_v39  ;;  %v397_v40 = vrot.slane %v396_v38, 1 }
 0x13f   : > { %v398_v41 = vadd.f32 %v397_v40, %v396_v38 }
 0x141   : > { %550 = vpush %v398_v41 }
 0x16e   : > { %s549_s19 = spop %548 }
 0x16f   : > { %v401_v42 = vstv %s549_s19 }
 0x172   : > { %s551_s26 = spop %550 }
 0x173   : > { %v402_v43 = vstv %s551_s26 }
 0x174   : > { %v403_v44 = vsel %vm400_vm7, %v401_v42, %v402_v43 }
 0x175   : > { %404 = vst [vmem:[%s219_s30] sm:$0x3] %v403_v44 }
 0x176   : > { %702 = shalt.err (!%p699_p2)
}
 0x177   : > { %s703_s15 = scalar_lea.hbm %s1003_s25, 32  ;;  %s707_s5 = scalar_lea.hbm %s1054_s2, 64 }
 0x178   : > { %p704_p9 = scmp.ne.s32.totalorder %s1003_s25, %s703_s15  ;;  %p708_p6 = scmp.lt.u32.totalorder %s1003_s25, %s1054_s2 }
 0x179   : > { %p709_p13 = scmp.lt.u32.totalorder %s707_s5, %s703_s15  ;;  %p711_p8 = scmp.lt.u32.totalorder %s703_s15, %s1003_s25 }
 0x17a   : > { %p705_p11 = pnand %p704_p9, %p1069_p0 }
 0x17b   : > { %p710_p5 = por %p709_p13, %p708_p6 }
 0x17c   : > { %p706_p3 = pneg %p705_p11 }
 0x17d   : > { %p712_p7 = por %p711_p8, %p710_p5 }
 0x17f   : > { %p713_p4 = pnand %p712_p7, %p706_p3 }
 0x181   : > { %716 = shalt.err (!%p713_p4)
}
 0x182   : > { %556 = dma.vmem_to_hbm [thread:$0]  (%p1069_p0), %s1005_s20, 32, %s1003_s25, %s406_s12  }
 0x183 PF: > { %s432_s21 = sand.u32 1, %s755_s9   ;;  %p1070_p10 = scmp.ne.s32.totalorder %s1060_s24, 0 }
 0x184   : > { %p1071_p12 = scmp.ge.s32.totalorder %s775_s14, 2  ;;  %s433_s19 = scalar_lea.sflag [#allocation4], %s432_s21 }
 0x186   : > { %p566_p1 = pnand %p1071_p12, %p1070_p10 }
 0x188   : > { %750 = dma.done.wait (!%p566_p1), %s433_s19, 32  }
 0x189   : > { %752 = vsyncadd (!%p566_p1), %s433_s19, 4294967264  ;;  %s21_s14 = sadd.s32 1, %s775_s14   ;;  %s1072_s9 = smov %s759_s10 }
 0x18a   : > { %p18_p2 = scmp.ge.s32.totalorder %s21_s14, 4   ;;  %s1073_s10 = smov %s763_s11 }
 0x18b   : > { %s1074_s11 = smov %s854_s23  ;;  %s1075_s12 = smov %s771_s13 }
 0x18c   : > { %s1076_s13 = smov %s1078_s17  ;;  %20 = sbr.rel (!%p18_p2) target bundleno = 8 (0x8), region = 86 }
 0x193   :  { %438 = vsyncpa [#allocation3], 1 }
 0x194   :  { %440 = vsyncpa [#allocation3 + $0x1], 1 }
 0x195   :  { %441 = vsyncpa [#allocation6], 1 }
 0x196   :  { %443 = vsyncpa [#allocation6 + $0x1], 1 }
 0x197   :  { %444 = vsyncpa [#allocation4], 1 }
 0x198   :  { %446 = vsyncpa [#allocation4 + $0x1], 1 }

</bundles_post_ra>
